<compile_context>
chip_gen: v5e
topology: v5e:2x2
jax: 0.10.0
libtpu: 0.0.40
codegen_flags: <defaults>
</compile_context>

<pallas_src>
import math
import jax
import jax.numpy as jnp
from jax.experimental import pallas as pl
from jax.experimental.pallas import tpu as pltpu


# ----------------------------------------------------------------------------
# helpers
# ----------------------------------------------------------------------------
def _round_up(x, m):
    return (x + m - 1) // m * m


def _pad2d(a, rows, cols):
    r, c = a.shape
    if r == rows and c == cols:
        return a
    return jnp.pad(a, ((0, rows - r), (0, cols - c)))


# ----------------------------------------------------------------------------
# Tiled GEMM + bias (+ optional GELU), bf16 in / bf16 out, f32 accumulator
# ----------------------------------------------------------------------------
def matmul_bias(x, w, b, activation=None, tm=512, tn=256, tk=256):
    """o = act(x @ w + b).  x:(M,K) bf16, w:(K,N) bf16, b:(N,) f32 -> (M,N) bf16."""
    M, K = x.shape
    N = w.shape[1]
    tm = min(tm, _round_up(M, 8))
    tn = min(tn, _round_up(N, 128))
    tk = min(tk, _round_up(K, 128))
    Mp, Np, Kp = _round_up(M, tm), _round_up(N, tn), _round_up(K, tk)

    xp = _pad2d(x, Mp, Kp).astype(jnp.bfloat16)      # no-op cast if already bf16
    wp = _pad2d(w, Kp, Np).astype(jnp.bfloat16)      # weights are pre-cast bf16
    bp = _pad2d(b.reshape(1, N).astype(jnp.float32), 1, Np)

    def kernel(x_ref, w_ref, b_ref, o_ref, acc_ref):
        @pl.when(pl.program_id(2) == 0)
        def _():
            acc_ref[...] = jnp.zeros_like(acc_ref)

        acc_ref[...] += jnp.dot(x_ref[...], w_ref[...],
                                preferred_element_type=jnp.float32)

        @pl.when(pl.program_id(2) == pl.num_programs(2) - 1)
        def _():
            y = acc_ref[...] + b_ref[...]
            if activation == "gelu":
                # TODO(synk): HF BERT default is exact erf-GELU; tanh approximation
                # is used here for guaranteed Mosaic lowering (small numeric drift).
                y = jax.nn.gelu(y, approximate=True)
            o_ref[...] = y.astype(o_ref.dtype)

    out = pl.pallas_call(
        kernel,
        out_shape=jax.ShapeDtypeStruct((Mp, Np), jnp.bfloat16),
        grid=(Mp // tm, Np // tn, Kp // tk),
        in_specs=[pl.BlockSpec((tm, tk), lambda i, j, k: (i, k)),
                  pl.BlockSpec((tk, tn), lambda i, j, k: (k, j)),
                  pl.BlockSpec((1, tn), lambda i, j, k: (0, j))],
        out_specs=pl.BlockSpec((tm, tn), lambda i, j, k: (i, j)),
        scratch_shapes=[pltpu.VMEM((tm, tn), jnp.float32)],
        compiler_params=pltpu.CompilerParams(
            dimension_semantics=("parallel", "parallel", "arbitrary")),
    )(xp, wp, bp)
    return out[:M, :N]


# ----------------------------------------------------------------------------
# K-tiled GEMM + bias + residual + LayerNorm fused epilogue (N = hidden, whole)
# ----------------------------------------------------------------------------
def matmul_bias_res_ln(x, w, b, res, gamma, beta, eps=1e-12, tm=256, tk=512):
    """LayerNorm(x @ w + b + res) over the last dim.
    K is tiled (f32 accumulator, LN flushed on the last K step) so the resident
    weight block is only (tk, N) — keeps VMEM well inside v5e's 16 MiB / v7x's
    32 MiB scoped defaults even for the FFN down-projection at BERT-base sizes.
    x, w, res are bf16; LN math is f32 in-register; output is bf16."""
    M, K = x.shape
    N = w.shape[1]
    tm = min(tm, _round_up(M, 8))
    tk = min(tk, _round_up(K, 128))
    Mp, Kp = _round_up(M, tm), _round_up(K, tk)

    xp = _pad2d(x, Mp, Kp).astype(jnp.bfloat16)
    wp = _pad2d(w, Kp, N).astype(jnp.bfloat16)
    rp = _pad2d(res, Mp, N).astype(jnp.bfloat16)      # residual stays bf16 on HBM
    bp = b.reshape(1, N).astype(jnp.float32)
    gp = gamma.reshape(1, N).astype(jnp.float32)
    btp = beta.reshape(1, N).astype(jnp.float32)

    def kernel(x_ref, w_ref, b_ref, r_ref, g_ref, bt_ref, o_ref, acc_ref):
        @pl.when(pl.program_id(1) == 0)
        def _():
            acc_ref[...] = jnp.zeros_like(acc_ref)

        acc_ref[...] += jnp.dot(x_ref[...], w_ref[...],
                                preferred_element_type=jnp.float32)

        @pl.when(pl.program_id(1) == pl.num_programs(1) - 1)
        def _():
            h = acc_ref[...] + b_ref[...] + r_ref[...].astype(jnp.float32)
            mean = jnp.mean(h, axis=-1, keepdims=True)
            var = jnp.mean(jnp.square(h - mean), axis=-1, keepdims=True)
            o_ref[...] = ((h - mean) * jax.lax.rsqrt(var + eps) * g_ref[...]
                          + bt_ref[...]).astype(o_ref.dtype)

    out = pl.pallas_call(
        kernel,
        out_shape=jax.ShapeDtypeStruct((Mp, N), jnp.bfloat16),
        grid=(Mp // tm, Kp // tk),
        in_specs=[pl.BlockSpec((tm, tk), lambda i, k: (i, k)),
                  pl.BlockSpec((tk, N), lambda i, k: (k, 0)),
                  pl.BlockSpec((1, N), lambda i, k: (0, 0)),
                  pl.BlockSpec((tm, N), lambda i, k: (i, 0)),
                  pl.BlockSpec((1, N), lambda i, k: (0, 0)),
                  pl.BlockSpec((1, N), lambda i, k: (0, 0))],
        out_specs=pl.BlockSpec((tm, N), lambda i, k: (i, 0)),
        scratch_shapes=[pltpu.VMEM((tm, N), jnp.float32)],
        compiler_params=pltpu.CompilerParams(
            dimension_semantics=("parallel", "arbitrary")),
    )(xp, wp, bp, rp, gp, btp)
    return out[:M, :N]


# ----------------------------------------------------------------------------
# Row-tiled LayerNorm (embeddings): f32 in, bf16 out
# ----------------------------------------------------------------------------
def layernorm(x, gamma, beta, eps=1e-12, tm=256):
    M, H = x.shape
    tm = min(tm, _round_up(M, 8))
    Mp = _round_up(M, tm)
    xp = _pad2d(x, Mp, H)

    def kernel(x_ref, g_ref, b_ref, o_ref):
        h = x_ref[...]
        mean = jnp.mean(h, axis=-1, keepdims=True)
        var = jnp.mean(jnp.square(h - mean), axis=-1, keepdims=True)
        o_ref[...] = ((h - mean) * jax.lax.rsqrt(var + eps) * g_ref[...]
                      + b_ref[...]).astype(o_ref.dtype)

    out = pl.pallas_call(
        kernel,
        out_shape=jax.ShapeDtypeStruct((Mp, H), jnp.bfloat16),
        grid=(Mp // tm,),
        in_specs=[pl.BlockSpec((tm, H), lambda i: (i, 0)),
                  pl.BlockSpec((1, H), lambda i: (0, 0)),
                  pl.BlockSpec((1, H), lambda i: (0, 0))],
        out_specs=pl.BlockSpec((tm, H), lambda i: (i, 0)),
        compiler_params=pltpu.CompilerParams(dimension_semantics=("parallel",)),
    )(xp, gamma.reshape(1, H).astype(jnp.float32),
      beta.reshape(1, H).astype(jnp.float32))
    return out[:M]


# ----------------------------------------------------------------------------
# Attention straight from the fused QKV tensor:
#   grid over batch, heads looped in-kernel (per-head (S,S) scores keep VMEM
#   small), lane-dense (1, S, H) output — no HBM head transposes at all.
# ----------------------------------------------------------------------------
def attention(qkv, attn_bias, scale, n_heads):
    """qkv : (B, S, 3H) bf16 (layout [q|k|v] along last dim);
    attn_bias : (B, 1, S) f32 additive mask.  Returns (B, S, H) bf16."""
    B, S, H3 = qkv.shape
    H = H3 // 3
    dh = H // n_heads

    def kernel(qkv_ref, m_ref, o_ref):
        bias = m_ref[0]                                        # (1, S) f32
        for h in range(n_heads):                               # static unroll
            q = qkv_ref[0, :, h * dh:(h + 1) * dh]             # (S, dh) bf16
            k = qkv_ref[0, :, H + h * dh:H + (h + 1) * dh]
            v = qkv_ref[0, :, 2 * H + h * dh:2 * H + (h + 1) * dh]
            s = jax.lax.dot_general(                           # (S, S) f32
                q, k, (((1,), (1,)), ((), ())),
                preferred_element_type=jnp.float32) * scale + bias
            s = s - jnp.max(s, axis=-1, keepdims=True)
            p = jnp.exp(s)
            # approx reciprocal runs on the EUP slot; ~1e-3 rel. error vs exact div
            p = p * pl.reciprocal(jnp.sum(p, axis=-1, keepdims=True), approx=True)
            o = jnp.dot(p.astype(jnp.bfloat16), v,
                        preferred_element_type=jnp.float32)
            o_ref[0, :, h * dh:(h + 1) * dh] = o.astype(o_ref.dtype)

    return pl.pallas_call(
        kernel,
        out_shape=jax.ShapeDtypeStruct((B, S, H), jnp.bfloat16),
        grid=(B,),
        in_specs=[pl.BlockSpec((1, S, H3), lambda b: (b, 0, 0)),
                  pl.BlockSpec((1, 1, S), lambda b: (b, 0, 0))],
        out_specs=pl.BlockSpec((1, S, H), lambda b: (b, 0, 0)),
        compiler_params=pltpu.CompilerParams(dimension_semantics=("parallel",)),
    )(qkv, attn_bias)


# ----------------------------------------------------------------------------
# Small synthetic BERT encoder (returns last hidden states, HF [0] output)
# ----------------------------------------------------------------------------
def bert_encode(p, input_ids, attention_mask):
    B, S = input_ids.shape
    H, nH = p["hidden"], p["n_heads"]
    dh = H // nH

    # embeddings (gather + adds are glue, stay in plain JAX)
    emb = (jnp.take(p["word_emb"], input_ids, axis=0)
           + p["pos_emb"][:S][None, :, :]
           + p["type_emb"][0][None, None, :])
    x = layernorm(emb.reshape(B * S, H), p["emb_ln_g"], p["emb_ln_b"])   # bf16

    attn_bias = ((1.0 - attention_mask.astype(jnp.float32)) * -1e9)[:, None, :]
    scale = 1.0 / math.sqrt(dh)

    for layer in p["layers"]:
        # fused QKV projection: single GEMM with N = 3H (lane-dense bf16 output)
        qkv = matmul_bias(x, layer["wqkv"], layer["bqkv"])               # (B*S, 3H)
        # free view to (B, S, 3H) — no transpose / split round trips
        ctx = attention(qkv.reshape(B, S, 3 * H), attn_bias, scale, nH)  # (B, S, H)
        # output projection fused with residual-add + LayerNorm (K-tiled)
        x = matmul_bias_res_ln(ctx.reshape(B * S, H), layer["wo"], layer["bo"],
                               x, layer["ln1_g"], layer["ln1_b"])
        # FFN: GEMM+GELU, then GEMM fused with residual-add + LayerNorm
        h1 = matmul_bias(x, layer["w1"], layer["b1"], activation="gelu")
        x = matmul_bias_res_ln(h1, layer["w2"], layer["b2"],
                               x, layer["ln2_g"], layer["ln2_b"])

    return x.reshape(B, S, H)


# ----------------------------------------------------------------------------
# BERTModelForClassification.forward (retrieval enabled)
# ----------------------------------------------------------------------------
def classification_forward(params, input_ids, attention_mask,
                           candidate_input_ids, candidate_attention_mask):
    B, S = input_ids.shape

    # Encode query + all candidates in ONE pass (concat along batch): weights
    # stream through VMEM once and every GEMM sees 2x the rows.
    all_ids = jnp.concatenate([input_ids, candidate_input_ids.reshape(-1, S)], axis=0)
    all_mask = jnp.concatenate([attention_mask,
                                candidate_attention_mask.reshape(-1, S)], axis=0)

    hidden = bert_encode(params["bert"], all_ids, all_mask)              # bf16
    cls = hidden[:, 0, :].astype(jnp.float32)                            # (B*(1+nc), H)
    query_cls = cls[:B]                                                  # (B, H)
    retrieved_cls = cls[B:].reshape(B, -1)                               # (B, H*nc)

    final_repr = jnp.concatenate([query_cls, retrieved_cls], axis=1)
    # classifier (M=B, N=n_classes) is far too small for the MXU — plain JAX
    logits = final_repr @ params["cls_w"] + params["cls_b"]              # (B, n_classes)
    return logits


# ----------------------------------------------------------------------------
# Deterministic parameter init (synthetic — no checkpoint load).
# GEMM weights are stored bf16 once (no per-call cast); LN params / biases f32.
# ----------------------------------------------------------------------------
def init_params(key, vocab=100, hidden=32, n_layers=2, n_heads=2,
                inter=64, max_pos=16, n_candidates=2, n_classes=3):
    keys = iter(jax.random.split(key, 256))

    def nrm(shape, scale=0.02, dtype=jnp.float32):
        return (scale * jax.random.normal(next(keys), shape,
                                          dtype=jnp.float32)).astype(dtype)

    def layer():
        return dict(
            # fused Q|K|V projection weights (bf16-resident)
            wqkv=nrm((hidden, 3 * hidden), dtype=jnp.bfloat16),
            bqkv=jnp.zeros((3 * hidden,), jnp.float32),
            wo=nrm((hidden, hidden), dtype=jnp.bfloat16),
            bo=jnp.zeros((hidden,), jnp.float32),
            ln1_g=jnp.ones((hidden,), jnp.float32),
            ln1_b=jnp.zeros((hidden,), jnp.float32),
            w1=nrm((hidden, inter), dtype=jnp.bfloat16),
            b1=jnp.zeros((inter,), jnp.float32),
            w2=nrm((inter, hidden), dtype=jnp.bfloat16),
            b2=jnp.zeros((hidden,), jnp.float32),
            ln2_g=jnp.ones((hidden,), jnp.float32),
            ln2_b=jnp.zeros((hidden,), jnp.float32),
        )

    bert = dict(
        hidden=hidden, n_heads=n_heads,
        word_emb=nrm((vocab, hidden)),
        pos_emb=nrm((max_pos, hidden)),
        type_emb=nrm((2, hidden)),
        emb_ln_g=jnp.ones((hidden,), jnp.float32),
        emb_ln_b=jnp.zeros((hidden,), jnp.float32),
        layers=[layer() for _ in range(n_layers)],
    )
    return dict(
        bert=bert,
        cls_w=nrm((hidden * (n_candidates + 1), n_classes)),
        cls_b=jnp.zeros((n_classes,), jnp.float32),
    )


# ----------------------------------------------------------------------------
if __name__ == "__main__":
    key = jax.random.PRNGKey(0)
    batch, seq, n_candidates, vocab = 2, 8, 2, 100

    params = init_params(key, vocab=vocab, n_candidates=n_candidates)

    k1, k2 = jax.random.split(key)
    input_ids = jax.random.randint(k1, (batch, seq), 0, vocab, dtype=jnp.int32)
    attention_mask = jnp.ones((batch, seq), dtype=jnp.int32)
    # zero out last token of second example to exercise the mask path
    attention_mask = attention_mask.at[1, -1].set(0)

    candidate_input_ids = jax.random.randint(
        k2, (batch, n_candidates, seq), 0, vocab, dtype=jnp.int32)
    candidate_attention_mask = jnp.ones((batch, n_candidates, seq), dtype=jnp.int32)

    logits = classification_forward(params, input_ids, attention_mask,
                                    candidate_input_ids, candidate_attention_mask)
    logits = jax.block_until_ready(logits)
    assert logits.shape == (batch, 3) and jnp.all(jnp.isfinite(logits))
    print("KERNEL_OK")
</pallas_src>

<mosaic_0001>
module attributes {stable_mosaic.version = 11 : i64} {
  func.func @kernel(%arg0: i32, %arg1: memref<48x32xf32, #tpu.memory_space<vmem>>, %arg2: memref<1x32xf32, #tpu.memory_space<vmem>>, %arg3: memref<1x32xf32, #tpu.memory_space<vmem>>, %arg4: memref<48x32xbf16, #tpu.memory_space<vmem>>) attributes {dimension_semantics = [#tpu.dimension_semantics<parallel>], iteration_bounds = array<i64: 1>, scalar_prefetch = 0 : i64, scratch_operands = 0 : i64, tpu.core_type = #tpu.core_type<tc>, window_params = [{transform_indices = @transform_0, window_bounds = array<i64: 48, 32>}, {pipeline_mode = #tpu.pipeline_mode<synchronous>, transform_indices = @transform_1, window_bounds = array<i64: 1, 32>}, {pipeline_mode = #tpu.pipeline_mode<synchronous>, transform_indices = @transform_2, window_bounds = array<i64: 1, 32>}, {transform_indices = @transform_3, window_bounds = array<i64: 48, 32>}]} {
    %c0 = arith.constant 0 : index
    %c0_0 = arith.constant 0 : index
    %0 = vector.load %arg1[%c0, %c0_0] : memref<48x32xf32, #tpu.memory_space<vmem>>, vector<48x32xf32>
    %cst = arith.constant dense<0.000000e+00> : vector<48xf32>
    %1 = vector.multi_reduction <add>, %0, %cst [1] : vector<48x32xf32> to vector<48xf32>
    %2 = vector.shape_cast %1 : vector<48xf32> to vector<48x1xf32>
    %cst_1 = arith.constant 3.200000e+01 : f32
    %3 = vector.broadcast %cst_1 : f32 to vector<48x1xf32>
    %4 = arith.divf %2, %3 : vector<48x1xf32>
    %5 = vector.broadcast %4 : vector<48x1xf32> to vector<48x32xf32>
    %6 = arith.subf %0, %5 : vector<48x32xf32>
    %7 = arith.mulf %6, %6 : vector<48x32xf32>
    %cst_2 = arith.constant dense<0.000000e+00> : vector<48xf32>
    %8 = vector.multi_reduction <add>, %7, %cst_2 [1] : vector<48x32xf32> to vector<48xf32>
    %9 = vector.shape_cast %8 : vector<48xf32> to vector<48x1xf32>
    %cst_3 = arith.constant 3.200000e+01 : f32
    %10 = vector.broadcast %cst_3 : f32 to vector<48x1xf32>
    %11 = arith.divf %9, %10 : vector<48x1xf32>
    %12 = vector.broadcast %4 : vector<48x1xf32> to vector<48x32xf32>
    %13 = arith.subf %0, %12 : vector<48x32xf32>
    %cst_4 = arith.constant 9.99999996E-13 : f32
    %14 = vector.broadcast %cst_4 : f32 to vector<48x1xf32>
    %15 = arith.addf %11, %14 : vector<48x1xf32>
    %16 = math.rsqrt %15 : vector<48x1xf32>
    %17 = vector.broadcast %16 : vector<48x1xf32> to vector<48x32xf32>
    %18 = arith.mulf %13, %17 : vector<48x32xf32>
    %c0_5 = arith.constant 0 : index
    %c0_6 = arith.constant 0 : index
    %19 = vector.load %arg2[%c0_5, %c0_6] : memref<1x32xf32, #tpu.memory_space<vmem>>, vector<1x32xf32>
    %20 = vector.broadcast %19 : vector<1x32xf32> to vector<48x32xf32>
    %21 = arith.mulf %18, %20 : vector<48x32xf32>
    %c0_7 = arith.constant 0 : index
    %c0_8 = arith.constant 0 : index
    %22 = vector.load %arg3[%c0_7, %c0_8] : memref<1x32xf32, #tpu.memory_space<vmem>>, vector<1x32xf32>
    %23 = vector.broadcast %22 : vector<1x32xf32> to vector<48x32xf32>
    %24 = arith.addf %21, %23 : vector<48x32xf32>
    %25 = arith.truncf %24 : vector<48x32xf32> to vector<48x32xbf16>
    %c0_9 = arith.constant 0 : index
    %c0_10 = arith.constant 0 : index
    %26 = vector.load %arg4[%c0_9, %c0_10] : memref<48x32xbf16, #tpu.memory_space<vmem>>, vector<48x32xbf16>
    tpu.vector_store %arg4[%c0_9, %c0_10], %25 {strides = array<i32>} : memref<48x32xbf16, #tpu.memory_space<vmem>>, vector<48x32xbf16>,
    return
  }
  func.func @transform_0(%arg0: i32) -> (i32, i32) {
    %c0_i32 = arith.constant 0 : i32
    %c0_i32_0 = arith.constant 0 : i32
    return %arg0, %c0_i32 : i32, i32
  }
  func.func @transform_1(%arg0: i32) -> (i32, i32) {
    %c0_i32 = arith.constant 0 : i32
    %c0_i32_0 = arith.constant 0 : i32
    %c0_i32_1 = arith.constant 0 : i32
    return %c0_i32, %c0_i32_0 : i32, i32
  }
  func.func @transform_2(%arg0: i32) -> (i32, i32) {
    %c0_i32 = arith.constant 0 : i32
    %c0_i32_0 = arith.constant 0 : i32
    %c0_i32_1 = arith.constant 0 : i32
    return %c0_i32, %c0_i32_0 : i32, i32
  }
  func.func @transform_3(%arg0: i32) -> (i32, i32) {
    %c0_i32 = arith.constant 0 : i32
    %c0_i32_0 = arith.constant 0 : i32
    return %arg0, %c0_i32 : i32, i32
  }
}

</mosaic_0001>

<bundles_post_ra>
// kernel: tpu_custom_call.1
= control target key start
LH: loop header
LB: loop body
LE: loop exit
PB: predicated region body
PF: predicated region fallthrough
CT: control target
= control target key end

     0   :  { %vm20_vm0 = vcmask 261120   ;;  %v214_v12 = vmov 32.0   ;;  %vm186_vm8 = vcmask 257024   ;;  %s373_s0 = inlined_call_operand.vmem [shape: f32[48,32], index: 0, kind: input, shape index: {}]   ;;  %s374_s1 = inlined_call_operand.vmem [shape: f32[1,32], index: 1, kind: input, shape index: {}]   ;;  %s375_s2 = inlined_call_operand.vmem [shape: f32[1,32], index: 2, kind: input, shape index: {}]   ;;  %s376_s3 = inlined_call_operand.vmem [shape: bf16[48,32], index: 3, kind: output, shape index: {}]  }
   0x1   :  { %v18_v0 = vld [vmem:[%s373_s0 + $0x20] sm:$0xff]  ;;  %v16_v1 = vld [vmem:[%s373_s0 + $0x10] sm:$0xff]  ;;  %v19_v6 = vld [vmem:[%s373_s0 + $0x28] sm:$0xff]  ;;  %200 = vrcp.f32 %v214_v12 }
   0x2   :  { %v14_v2 = vld [vmem:[%s373_s0] sm:$0xff]  ;;  %v33_v3 = vsel %vm20_vm0, %v18_v0, 0.0  ;;  %v27_v4 = vsel %vm20_vm0, %v16_v1, 0.0  ;;  %v17_v7 = vld [vmem:[%s373_s0 + $0x18] sm:$0xff]  ;;  %v15_v8 = vld [vmem:[%s373_s0 + $0x8] sm:$0xff]  ;;  %v36_v9 = vsel %vm20_vm0, %v19_v6, 0.0 }
   0x3   :  { %v21_v5 = vsel %vm20_vm0, %v14_v2, 0.0  ;;  %34 = vadd.xlane.f32.xlu2 %v33_v3  ;;  %28 = vadd.xlane.f32.xlu1 %v27_v4  ;;  %v30_v10 = vsel %vm20_vm0, %v17_v7, 0.0  ;;  %v24_v11 = vsel %vm20_vm0, %v15_v8, 0.0 }
   0x4   :  { %22 = vadd.xlane.f32.xlu0 %v21_v5 }
   0x7   :  { %v201_v13 = vpop.eup %200 }
   0x8   :  { %v40_v14 = vmul.f32 32.0, %v201_v13  ;;  %vm44_vm1 = vweird.f32 %v201_v13 }
   0xa   :  { %v41_v15 = vsub.f32 1.0, %v40_v14 }
   0xb   :  { %37 = vadd.xlane.f32.xlu2 %v36_v9  ;;  %31 = vadd.xlane.f32.xlu1 %v30_v10 }
   0xc   :  { %25 = vadd.xlane.f32.xlu0 %v24_v11  ;;  %v42_v16 = vmul.f32 %v201_v13, %v41_v15 }
   0xe   :  { %v43_v17 = vadd.f32 %v201_v13, %v42_v16 }
  0x10   :  { %v259_v18 = vsel %vm44_vm1, %v201_v13, %v43_v17 }
  0x76   :  { %v35_v19 = vpop.xlane.xlu2 %34  ;;  %v29_v20 = vpop.xlane.xlu1 %28 }
  0x77   :  { %v48_v21 = vmul.f32 %v259_v18, %v29_v20  ;;  %v23_v22 = vpop.xlane.xlu0 %22  ;;  %v50_v38 = vmul.f32 %v259_v18, %v35_v19  ;;  %v314_v19 = vld [vmem:[%s374_s1] ss:$0 sm:$0xff] }
  0x78   :  { %v46_v23 = vmul.f32 %v259_v18, %v23_v22 }
  0x79   :  { %v263_v24 = vsub.f32 %v16_v1, %v48_v21  ;;  %v291_v45 = vsub.f32 %v18_v0, %v50_v38 }
  0x7a   :  { %v265_v25 = vsub.f32 %v14_v2, %v46_v23 }
  0x7b   :  { %v60_v26 = vmul.f32 %v263_v24, %v263_v24  ;;  %v62_v47 = vmul.f32 %v291_v45, %v291_v45 }
  0x7c   :  { %v58_v27 = vmul.f32 %v265_v25, %v265_v25 }
  0x7d   :  { %v70_v28 = vsel %vm20_vm0, %v60_v26, 0.0  ;;  %v76_v48 = vsel %vm20_vm0, %v62_v47, 0.0  ;;  %v321_v26 = vld [vmem:[%s375_s2] ss:$0 sm:$0xff] }
  0x7e   :  { %v38_v29 = vpop.xlane.xlu2 %37  ;;  %71 = vadd.xlane.f32.xlu2 %v70_v28  ;;  %v32_v30 = vpop.xlane.xlu1 %31  ;;  %v64_v31 = vsel %vm20_vm0, %v58_v27, 0.0 }
  0x7f   :  { %v51_v32 = vmul.f32 %v259_v18, %v38_v29  ;;  %v49_v33 = vmul.f32 %v259_v18, %v32_v30  ;;  %65 = vadd.xlane.f32.xlu0 %v64_v31  ;;  %v26_v34 = vpop.xlane.xlu0 %25 }
  0x80   :  { %v47_v35 = vmul.f32 %v259_v18, %v26_v34 }
  0x81   :  { %v276_v36 = vsub.f32 %v19_v6, %v51_v32  ;;  %v278_v37 = vsub.f32 %v17_v7, %v49_v33 }
  0x82   :  { %v281_v39 = vsub.f32 %v15_v8, %v47_v35 }
  0x83   :  { %v63_v40 = vmul.f32 %v276_v36, %v276_v36  ;;  %v61_v41 = vmul.f32 %v278_v37, %v278_v37 }
  0x84   :  { %v59_v42 = vmul.f32 %v281_v39, %v281_v39 }
  0x85   :  { %v79_v43 = vsel %vm20_vm0, %v63_v40, 0.0  ;;  %v73_v44 = vsel %vm20_vm0, %v61_v41, 0.0 }
  0x86   :  { %80 = vadd.xlane.f32.xlu2 %v79_v43  ;;  %v67_v46 = vsel %vm20_vm0, %v59_v42, 0.0 }
  0x87   :  { %74 = vadd.xlane.f32.xlu0 %v73_v44  ;;  %68 = vadd.xlane.f32.xlu1 %v67_v46 }
  0x8f   :  { %77 = vadd.xlane.f32.xlu1 %v76_v48 }
  0xf1   :  { %v72_v49 = vpop.xlane.xlu2 %71 }
  0xf2   :  { %v84_v50 = vmul.f32 %v72_v49, %v259_v18  ;;  %v66_v51 = vpop.xlane.xlu0 %65 }
  0xf3   :  { %v82_v52 = vmul.f32 %v66_v51, %v259_v18 }
  0xf4   :  { %v90_v53 = vadd.f32 1e-12, %v84_v50 }
  0xf5   :  { %v88_v54 = vadd.f32 1e-12, %v82_v52 }
  0xf6   :  { %202 = vrsqrt.f32 %v90_v53  ;;  %vm120_vm2 = vweird.f32 %v90_v53 }
  0xf7   :  { %204 = vrsqrt.f32 %v88_v54  ;;  %vm100_vm6 = vweird.f32 %v88_v54 }
  0xf9   :  { %v81_v55 = vpop.xlane.xlu2 %80 }
  0xfa   :  { %v87_v56 = vmul.f32 %v81_v55, %v259_v18  ;;  %v69_v57 = vpop.xlane.xlu1 %68  ;;  %v75_v58 = vpop.xlane.xlu0 %74 }
  0xfb   :  { %v83_v59 = vmul.f32 %v69_v57, %v259_v18  ;;  %v85_v60 = vmul.f32 %v75_v58, %v259_v18 }
  0xfc   :  { %v203_v61 = vpop.eup %202  ;;  %v93_v62 = vadd.f32 1e-12, %v87_v56 }
  0xfd   :  { %v205_v63 = vpop.eup %204  ;;  %v115_v0 = vmul.f32 %v203_v61, %v90_v53  ;;  %v302_v1 = vadd.f32 1e-12, %v83_v59  ;;  %v304_v2 = vadd.f32 1e-12, %v85_v60  ;;  %vm121_vm3 = vweird.f32 %v203_v61 }
  0xfe   :  { %v95_v3 = vmul.f32 %v205_v63, %v88_v54  ;;  %206 = vrsqrt.f32 %v93_v62  ;;  %vm101_vm4 = vweird.f32 %v205_v63  ;;  %vm122_vm5 = vmor %vm120_vm2, %vm121_vm3  ;;  %vm150_vm9 = vweird.f32 %v93_v62 }
  0xff   :  { %v116_v4 = vmul.f32 %v203_v61, %v115_v0  ;;  %208 = vrsqrt.f32 %v302_v1  ;;  %vm102_vm7 = vmor %vm100_vm6, %vm101_vm4  ;;  %vm130_vm12 = vweird.f32 %v304_v2  ;;  %vm110_vm15 = vweird.f32 %v302_v1 }
 0x100   :  { %v96_v5 = vmul.f32 %v205_v63, %v95_v3  ;;  %210 = vrsqrt.f32 %v304_v2 }
 0x101   :  { %v117_v6 = vmul.f32 0.5, %v116_v4 }
 0x102   :  { %v97_v7 = vmul.f32 0.5, %v96_v5  ;;  %v78_v8 = vpop.xlane.xlu1 %77 }
 0x103   :  { %v118_v9 = vsub.f32 1.5, %v117_v6  ;;  %v86_v10 = vmul.f32 %v78_v8, %v259_v18 }
 0x104   :  { %v207_v11 = vpop.eup %206  ;;  %v98_v12 = vsub.f32 1.5, %v97_v7 }
 0x105   :  { %v209_v13 = vpop.eup %208  ;;  %v119_v14 = vmul.f32 %v203_v61, %v118_v9  ;;  %v145_v15 = vmul.f32 %v207_v11, %v93_v62  ;;  %v309_v16 = vadd.f32 1e-12, %v86_v10  ;;  %vm151_vm10 = vweird.f32 %v207_v11 }
 0x106   :  { %v211_v17 = vpop.eup %210  ;;  %v99_v20 = vmul.f32 %v205_v63, %v98_v12  ;;  %v105_v21 = vmul.f32 %v209_v13, %v302_v1  ;;  %vm111_vm11 = vweird.f32 %v209_v13  ;;  %vm152_vm14 = vmor %vm150_vm9, %vm151_vm10 }
 0x107   :  { %v123_v18 = vsel %vm122_vm5, %v203_v61, %v119_v14  ;;  %v146_v22 = vmul.f32 %v207_v11, %v145_v15  ;;  %v125_v23 = vmul.f32 %v211_v17, %v304_v2  ;;  %212 = vrsqrt.f32 %v309_v16  ;;  %vm112_vm0 = vmor %vm110_vm15, %vm111_vm11 }
 0x108   :  { %v156_v27 = vmul.f32 %v123_v18, %v263_v24  ;;  %v103_v28 = vsel %vm102_vm7, %v205_v63, %v99_v20  ;;  %v106_v29 = vmul.f32 %v209_v13, %v105_v21  ;;  %vm131_vm13 = vweird.f32 %v211_v17 }
 0x109   :  { %v154_v30 = vmul.f32 %v103_v28, %v265_v25  ;;  %v147_v31 = vmul.f32 0.5, %v146_v22  ;;  %v126_v32 = vmul.f32 %v211_v17, %v125_v23  ;;  %vm132_vm1 = vmor %vm130_vm12, %vm131_vm13  ;;  %vm140_vm3 = vweird.f32 %v309_v16 }
 0x10a   :  { %v166_v33 = vmul.f32 %v314_v19, %v156_v27  ;;  %v107_v34 = vmul.f32 0.5, %v106_v29 }
 0x10b   :  { %v164_v35 = vmul.f32 %v314_v19, %v154_v30  ;;  %v148_v38 = vsub.f32 1.5, %v147_v31  ;;  %v127_v40 = vmul.f32 0.5, %v126_v32 }
 0x10c   :  { %v176_v24 = vadd.f32 %v321_v26, %v166_v33  ;;  %v108_v41 = vsub.f32 1.5, %v107_v34 }
 0x10d   :  { %v174_v25 = vadd.f32 %v321_v26, %v164_v35  ;;  %v149_v42 = vmul.f32 %v207_v11, %v148_v38  ;;  %v128_v43 = vsub.f32 1.5, %v127_v40  ;;  %v213_v44 = vpop.eup %212 }
 0x10e   :  { %v182_v46 = vpack.c.bf16 %v176_v24, %v176_v24  ;;  %v109_v47 = vmul.f32 %v209_v13, %v108_v41  ;;  %v135_v51 = vmul.f32 %v213_v44, %v309_v16  ;;  %vm141_vm2 = vweird.f32 %v213_v44 }
 0x10f   :  { %v180_v48 = vpack.c.bf16 %v174_v25, %v174_v25  ;;  %v153_v49 = vsel %vm152_vm14, %v207_v11, %v149_v42  ;;  %v129_v50 = vmul.f32 %v211_v17, %v128_v43  ;;  %vm142_vm4 = vmor %vm140_vm3, %vm141_vm2 }
 0x110   :  { %189 = vst.msk [vmem:[%s376_s3 + $0x8] sm:$0xf] %vm186_vm8, %v182_v46  ;;  %v159_v52 = vmul.f32 %v153_v49, %v276_v36  ;;  %v113_v53 = vsel %vm112_vm0, %v209_v13, %v109_v47  ;;  %v136_v56 = vmul.f32 %v213_v44, %v135_v51 }
 0x111   :  { %187 = vst.msk [vmem:[%s376_s3] sm:$0xf] %vm186_vm8, %v180_v48  ;;  %v155_v54 = vmul.f32 %v113_v53, %v281_v39  ;;  %v133_v55 = vsel %vm132_vm1, %v211_v17, %v129_v50 }
 0x112   :  { %v169_v57 = vmul.f32 %v314_v19, %v159_v52  ;;  %v157_v58 = vmul.f32 %v133_v55, %v278_v37  ;;  %v137_v36 = vmul.f32 0.5, %v136_v56 }
 0x113   :  { %v165_v59 = vmul.f32 %v314_v19, %v155_v54 }
 0x114   :  { %v179_v60 = vadd.f32 %v321_v26, %v169_v57  ;;  %v167_v61 = vmul.f32 %v314_v19, %v157_v58  ;;  %v138_v63 = vsub.f32 1.5, %v137_v36 }
 0x115   :  { %v175_v62 = vadd.f32 %v321_v26, %v165_v59 }
 0x116   :  { %v185_v0 = vpack.c.bf16 %v179_v60, %v179_v60  ;;  %v177_v39 = vadd.f32 %v321_v26, %v167_v61  ;;  %v139_v2 = vmul.f32 %v213_v44, %v138_v63 }
 0x117   :  { %v181_v1 = vpack.c.bf16 %v175_v62, %v175_v62 }
 0x118   :  { %192 = vst.msk [vmem:[%s376_s3 + $0x14] sm:$0xf] %vm186_vm8, %v185_v0  ;;  %v183_v37 = vpack.c.bf16 %v177_v39, %v177_v39  ;;  %v143_v3 = vsel %vm142_vm4, %v213_v44, %v139_v2 }
 0x119   :  { %188 = vst.msk [vmem:[%s376_s3 + $0x4] sm:$0xf] %vm186_vm8, %v181_v1  ;;  %v158_v4 = vmul.f32 %v143_v3, %v291_v45 }
 0x11a   :  { %190 = vst.msk [vmem:[%s376_s3 + $0xc] sm:$0xf] %vm186_vm8, %v183_v37 }
 0x11b   :  { %v168_v5 = vmul.f32 %v314_v19, %v158_v4 }
 0x11d   :  { %v178_v6 = vadd.f32 %v321_v26, %v168_v5 }
 0x11f   :  { %v184_v7 = vpack.c.bf16 %v178_v6, %v178_v6 }
 0x121   :  { %191 = vst.msk [vmem:[%s376_s3 + $0x10] sm:$0xf] %vm186_vm8, %v184_v7 }

</bundles_post_ra>
